<compile_context>
chip_gen: v7x
topology: tpu7x:2x2x1
jax: 0.10.0
libtpu: 0.0.40
codegen_flags: <defaults>
</compile_context>

<pallas_src>
import functools

import jax
import jax.numpy as jnp
from jax.experimental import pallas as pl
from jax.experimental.pallas import tpu as pltpu

COMPUTE_DTYPE = jnp.bfloat16  # MXU input dtype; accumulation / LN / softmax are f32.


# ----------------------------------------------------------------------------
# Helpers
# ----------------------------------------------------------------------------
def _round_up(x, m):
    return ((x + m - 1) // m) * m


def _gelu_exact(x):
    # torch.nn.GELU default: exact erf formulation (computed in f32).
    return 0.5 * x * (1.0 + jax.lax.erf(x * 0.7071067811865476))


@functools.lru_cache(maxsize=None)
def _device_prefs():
    """Generation-aware tile preferences and scoped-VMEM limit."""
    vmem_cap = 64 * 1024 * 1024
    try:
        info = pltpu.get_tpu_info()
        vmem_cap = int(getattr(info, "vmem_capacity_bytes", vmem_cap))
    except Exception:
        pass
    if vmem_cap >= 128 * 1024 * 1024:
        # v5e / v6e (128 MiB VMEM): larger M tiles -> weights streamed fewer times.
        return {"tm": 512, "tn": 256, "tk": 512, "vmem_limit": 64 * 1024 * 1024}
    # v7x (64 MiB VMEM per TensorCore): tighter tiles and limit.
    return {"tm": 256, "tn": 256, "tk": 512, "vmem_limit": 48 * 1024 * 1024}


# ----------------------------------------------------------------------------
# Fused (LayerNorm?) -> matmul -> (+bias) -> (GELU?) -> (+residual) kernel
# ----------------------------------------------------------------------------
def _fused_linear_kernel(x_ref, w_ref, *rest, has_ln, has_bias, has_res,
                         activation, single_k):
    idx = 0
    if has_ln:
        g_ref, be_ref = rest[idx], rest[idx + 1]
        idx += 2
    if has_bias:
        b_ref = rest[idx]
        idx += 1
    if has_res:
        r_ref = rest[idx]
        idx += 1
    o_ref = rest[idx]
    idx += 1
    if has_ln:
        ln_ref = rest[idx]          # (tm, K) cached normalized activations
        idx += 1
    if not single_k:
        acc_ref = rest[idx]         # (tm, tn) f32 accumulator
        idx += 1

    if has_ln:
        # LayerNorm over the full (untiled) K axis, eps=1e-5 like nn.LayerNorm.
        # Computed once per M-tile (first N-tile only) and cached in VMEM; the
        # N grid axis is "arbitrary" so the cache stays on one core.
        @pl.when(pl.program_id(1) == 0)
        def _():
            xf = x_ref[...].astype(jnp.float32)
            mean = jnp.mean(xf, axis=-1, keepdims=True)
            var = jnp.mean((xf - mean) ** 2, axis=-1, keepdims=True)
            xn = (xf - mean) * jax.lax.rsqrt(var + 1e-5)
            xn = xn * g_ref[...] + be_ref[...]
            ln_ref[...] = xn.astype(ln_ref.dtype)

        x = ln_ref[...]
    else:
        x = x_ref[...]

    def _epilogue(y):
        if has_bias:
            y = y + b_ref[...]
        if activation == "gelu":
            y = _gelu_exact(y)
        if has_res:
            y = y + r_ref[...].astype(jnp.float32)
        return y.astype(o_ref.dtype)

    if single_k:
        # Single K step: no f32 accumulator round-trip, write o_ref directly.
        o_ref[...] = _epilogue(
            jnp.dot(x, w_ref[...], preferred_element_type=jnp.float32))
    else:
        @pl.when(pl.program_id(2) == 0)
        def _():
            acc_ref[...] = jnp.zeros_like(acc_ref)

        acc_ref[...] += jnp.dot(x, w_ref[...], preferred_element_type=jnp.float32)

        @pl.when(pl.program_id(2) == pl.num_programs(2) - 1)
        def _():
            o_ref[...] = _epilogue(acc_ref[...])


def fused_linear(x, w, b=None, *, activation="none", residual=None,
                 ln_gamma=None, ln_beta=None, out_dtype=None):
    """y = [LN(x)] @ w (+ b) (-> GELU) (+ residual), tiled over (M, N, K)."""
    M, K = x.shape
    Kw, N = w.shape
    assert K == Kw
    has_ln = ln_gamma is not None
    has_bias = b is not None
    has_res = residual is not None
    out_dtype = out_dtype or x.dtype

    prefs = _device_prefs()
    tm_pref, tn_pref, tk_pref = prefs["tm"], prefs["tn"], prefs["tk"]

    # --- tile / padding choices ------------------------------------------
    if M <= tm_pref:
        tm, M_pad = M, M
    else:
        tm, M_pad = tm_pref, _round_up(M, tm_pref)
    if N <= tn_pref:
        tn, N_pad = N, N
    else:
        tn, N_pad = tn_pref, _round_up(N, tn_pref)
    if has_ln or K <= tk_pref:
        tk, K_pad = K, K            # LN needs the whole feature axis in one block.
    else:
        tk, K_pad = tk_pref, _round_up(K, tk_pref)
    single_k = (K_pad == tk)

    # LN input stays in its own dtype (f32 residual stream): normalization runs
    # in f32 in-kernel; only the normalized result is cast to bf16 for the MXU.
    xp = x if has_ln else x.astype(COMPUTE_DTYPE)
    if (M_pad, K_pad) != (M, K):
        xp = jnp.pad(xp, ((0, M_pad - M), (0, K_pad - K)))
    wp = w.astype(COMPUTE_DTYPE)
    if (K_pad, N_pad) != (K, N):
        wp = jnp.pad(wp, ((0, K_pad - K), (0, N_pad - N)))

    if single_k:
        w_spec = pl.BlockSpec((tk, tn), lambda i, j, k: (k, j))
    else:
        # K-varying weight stream: deeper buffering keeps the weight DMA hidden.
        w_spec = pl.BlockSpec((tk, tn), lambda i, j, k: (k, j),
                              pipeline_mode=pl.Buffered(3))

    inputs = [xp, wp]
    in_specs = [pl.BlockSpec((tm, tk), lambda i, j, k: (i, k)), w_spec]
    if has_ln:
        inputs += [ln_gamma.reshape(1, K).astype(jnp.float32),
                   ln_beta.reshape(1, K).astype(jnp.float32)]
        in_specs += [pl.BlockSpec((1, K), lambda i, j, k: (0, 0)),
                     pl.BlockSpec((1, K), lambda i, j, k: (0, 0))]
    if has_bias:
        bb = b.reshape(1, N).astype(jnp.float32)
        if N_pad != N:
            bb = jnp.pad(bb, ((0, 0), (0, N_pad - N)))
        inputs.append(bb)
        in_specs.append(pl.BlockSpec((1, tn), lambda i, j, k: (0, j)))
    if has_res:
        rp = residual.astype(jnp.float32)
        if (M_pad, N_pad) != (M, N):
            rp = jnp.pad(rp, ((0, M_pad - M), (0, N_pad - N)))
        inputs.append(rp)
        in_specs.append(pl.BlockSpec((tm, tn), lambda i, j, k: (i, j)))

    scratch_shapes = []
    if has_ln:
        scratch_shapes.append(pltpu.VMEM((tm, K), COMPUTE_DTYPE))
    if not single_k:
        scratch_shapes.append(pltpu.VMEM((tm, tn), jnp.float32))

    # The LN cache is only valid if the N axis is not split across cores.
    n_sem = "arbitrary" if has_ln else "parallel"
    grid = (M_pad // tm, N_pad // tn, K_pad // tk)

    out = pl.pallas_call(
        functools.partial(_fused_linear_kernel, has_ln=has_ln,
                          has_bias=has_bias, has_res=has_res,
                          activation=activation, single_k=single_k),
        out_shape=jax.ShapeDtypeStruct((M_pad, N_pad), out_dtype),
        grid=grid,
        in_specs=in_specs,
        out_specs=pl.BlockSpec((tm, tn), lambda i, j, k: (i, j)),
        scratch_shapes=scratch_shapes,
        compiler_params=pltpu.CompilerParams(
            dimension_semantics=("parallel", n_sem, "arbitrary"),
            vmem_limit_bytes=prefs["vmem_limit"]),
    )(*inputs)

    if (M_pad, N_pad) != (M, N):
        out = out[:M, :N]
    return out


# ----------------------------------------------------------------------------
# Multi-head attention core: per-batch block, per-head ref slices and stores
# ----------------------------------------------------------------------------
def _attention_kernel(qkv_ref, o_ref, *, heads, d, dh):
    # qkv columns: [q(0:D) | k(D:2D) | v(2D:3D)]; the attention scale is already
    # folded into the Q weight columns, so no in-kernel scaling is needed.
    for h in range(heads):                       # unrolled; per-head softmax
        q = qkv_ref[0, :, h * dh:(h + 1) * dh]
        k = qkv_ref[0, :, d + h * dh: d + (h + 1) * dh]
        v = qkv_ref[0, :, 2 * d + h * dh: 2 * d + (h + 1) * dh]

        s = jax.lax.dot_general(
            q, k, dimension_numbers=(((1,), (1,)), ((), ())),
            preferred_element_type=jnp.float32)              # (N, N)
        s = s - jnp.max(s, axis=-1, keepdims=True)
        p = jnp.exp(s)
        p = p * pl.reciprocal(jnp.sum(p, axis=-1, keepdims=True), approx=True)
        out_h = jnp.dot(p.astype(v.dtype), v,
                        preferred_element_type=jnp.float32)   # (N, dh)
        # Store this head's columns directly; live set stays one head wide.
        o_ref[0, :, h * dh:(h + 1) * dh] = out_h.astype(o_ref.dtype)


def attention(qkv, heads):
    """out[:, :, h*dh:(h+1)*dh] = softmax(q_h k_h^T) v_h  (scale pre-folded)."""
    # TODO(synk): for long sequences (N >> 1k) add head / KV-block grid axes with
    # an online-softmax (flash) accumulator to bound VMEM and feed both v7x
    # TensorCores; at ViT-sized N the full (N, N) scores fit comfortably.
    B, N, three_d = qkv.shape
    D = three_d // 3
    dh = D // heads
    return pl.pallas_call(
        functools.partial(_attention_kernel, heads=heads, d=D, dh=dh),
        out_shape=jax.ShapeDtypeStruct((B, N, D), qkv.dtype),
        grid=(B,),
        in_specs=[pl.BlockSpec((1, N, three_d), lambda b: (b, 0, 0))],
        out_specs=pl.BlockSpec((1, N, D), lambda b: (b, 0, 0)),
        compiler_params=pltpu.CompilerParams(
            dimension_semantics=("parallel",),
            vmem_limit_bytes=_device_prefs()["vmem_limit"]),
    )(qkv)


# ----------------------------------------------------------------------------
# Classifier head: one fused pallas_call (Linear -> GELU -> Linear), lane-dense
# ----------------------------------------------------------------------------
def _mlp_head_kernel(x_ref, w1_ref, b1_ref, w2_ref, b2_ref, o_ref):
    h = jnp.dot(x_ref[...], w1_ref[...], preferred_element_type=jnp.float32)
    h = _gelu_exact(h + b1_ref[...])
    y = jnp.dot(h, w2_ref[...], preferred_element_type=jnp.float32)
    o_ref[...] = (y + b2_ref[...]).astype(o_ref.dtype)


def mlp_head(x, w1, b1, w2, b2, *, num_classes):
    B, D = x.shape
    H = w1.shape[1]
    C_pad = max(_round_up(num_classes, 128), 128)      # lane-dense logits slab
    w2p = jnp.pad(w2.astype(jnp.float32), ((0, 0), (0, C_pad - num_classes)))
    b2p = jnp.pad(b2.reshape(1, -1).astype(jnp.float32),
                  ((0, 0), (0, C_pad - num_classes)))
    out = pl.pallas_call(
        _mlp_head_kernel,
        out_shape=jax.ShapeDtypeStruct((B, C_pad), jnp.float32),
        grid=(1,),
        in_specs=[pl.BlockSpec((B, D), lambda i: (0, 0)),
                  pl.BlockSpec((D, H), lambda i: (0, 0)),
                  pl.BlockSpec((1, H), lambda i: (0, 0)),
                  pl.BlockSpec((H, C_pad), lambda i: (0, 0)),
                  pl.BlockSpec((1, C_pad), lambda i: (0, 0))],
        out_specs=pl.BlockSpec((B, C_pad), lambda i: (0, 0)),
        compiler_params=pltpu.CompilerParams(
            dimension_semantics=("arbitrary",)),
    )(x.astype(jnp.float32), w1.astype(jnp.float32),
      b1.reshape(1, -1).astype(jnp.float32), w2p, b2p)
    return out[:, :num_classes]


# ----------------------------------------------------------------------------
# Model glue (plain JAX): patchify, cls concat, parameter plumbing
# ----------------------------------------------------------------------------
def patchify(img, p):
    # 'b c (h p1) (w p2) -> b (h w) (p1 p2 c)'
    b, c, H, W = img.shape
    h, w = H // p, W // p
    x = img.reshape(b, c, h, p, w, p)
    x = jnp.transpose(x, (0, 2, 4, 3, 5, 1))  # b h w p1 p2 c
    return x.reshape(b, h * w, p * p * c)


def transformer(x2d, layers, heads, B, N, D):
    for lp in layers:
        # Residual(PreNorm(Attention)):  x = to_out(attn(LN(x))) + x
        qkv = fused_linear(x2d, lp["w_qkv"], None,               # to_qkv: no bias
                           ln_gamma=lp["ln1_g"], ln_beta=lp["ln1_b"],
                           out_dtype=COMPUTE_DTYPE)
        attn = attention(qkv.reshape(B, N, 3 * D), heads)        # (B, N, D)
        x2d = fused_linear(attn.reshape(B * N, D), lp["w_out"], lp["b_out"],
                           residual=x2d, out_dtype=jnp.float32)
        # Residual(PreNorm(FeedForward)):  x = W2(GELU(W1(LN(x)))) + x
        h = fused_linear(x2d, lp["w1"], lp["b1"], activation="gelu",
                         ln_gamma=lp["ln2_g"], ln_beta=lp["ln2_b"],
                         out_dtype=COMPUTE_DTYPE)
        x2d = fused_linear(h, lp["w2"], lp["b2"], residual=x2d,
                           out_dtype=jnp.float32)
    return x2d


def vit_forward(img, params, *, patch_size, heads):
    # classification=True, mask=False path of ViT.forward (dropout = identity).
    B = img.shape[0]
    x = patchify(img, patch_size)                            # (B, Np, patch_dim)
    _, Np, Pd = x.shape
    D = params["w_embed"].shape[1]

    # Embedding; residual stream is carried in f32 from here on.
    x = fused_linear(x.reshape(B * Np, Pd), params["w_embed"], params["b_embed"],
                     out_dtype=jnp.float32)
    x = x.reshape(B, Np, D)

    cls = jnp.broadcast_to(params["cls_token"].astype(jnp.float32), (B, 1, D))
    x = jnp.concatenate([cls, x], axis=1)                    # (B, Np+1, D)
    N = Np + 1

    x2d = transformer(x.reshape(B * N, D), params["layers"], heads, B, N, D)

    cls_out = x2d.reshape(B, N, D)[:, 0]                     # (B, D) f32
    logits = mlp_head(cls_out, params["head_w1"], params["head_b1"],
                      params["head_w2"], params["head_b2"],
                      num_classes=params["head_w2"].shape[1])
    return logits.astype(jnp.float32)


def fold_attention_scale(params, heads):
    """One-time weight transform: scale folded into Q columns of w_qkv.

    (x Wq * scale) (x Wk)^T == scale * (x Wq)(x Wk)^T, so the in-kernel q*scale
    multiply is eliminated for free.
    """
    dim = params["w_embed"].shape[1]
    scale = (dim / heads) ** (-0.5)
    out = dict(params)
    out["layers"] = []
    for lp in params["layers"]:
        lp = dict(lp)
        w = lp["w_qkv"]
        lp["w_qkv"] = jnp.concatenate([w[:, :dim] * scale, w[:, dim:]], axis=1)
        out["layers"].append(lp)
    return out


# ----------------------------------------------------------------------------
# Deterministic parameter init
# ----------------------------------------------------------------------------
def init_params(key, *, patch_dim, dim, depth, mlp_dim, num_classes):
    keys = iter(jax.random.split(key, 8 + depth * 10))

    def nrm(shape, scale=0.02):
        return (scale * jax.random.normal(next(keys), shape)).astype(jnp.float32)

    params = {
        "w_embed": nrm((patch_dim, dim)),
        "b_embed": nrm((dim,)),
        "cls_token": jax.random.normal(next(keys), (1, 1, dim)).astype(jnp.float32),
        "head_w1": nrm((dim, mlp_dim)),
        "head_b1": nrm((mlp_dim,)),
        "head_w2": nrm((mlp_dim, num_classes)),
        "head_b2": nrm((num_classes,)),
        "layers": [],
    }
    for _ in range(depth):
        params["layers"].append({
            "ln1_g": jnp.ones((dim,), jnp.float32),
            "ln1_b": jnp.zeros((dim,), jnp.float32),
            "w_qkv": nrm((dim, 3 * dim)),
            "w_out": nrm((dim, dim)),
            "b_out": nrm((dim,)),
            "ln2_g": jnp.ones((dim,), jnp.float32),
            "ln2_b": jnp.zeros((dim,), jnp.float32),
            "w1": nrm((dim, mlp_dim)),
            "b1": nrm((mlp_dim,)),
            "w2": nrm((mlp_dim, dim)),
            "b2": nrm((dim,)),
        })
    return params


# ----------------------------------------------------------------------------
if __name__ == "__main__":
    # Small ViT config consistent with the module defaults (channels=2).
    image_size = 16
    patch_size = 4
    channels = 2
    dim = 32
    depth = 2
    heads = 8
    mlp_dim = 64
    num_classes = 10
    batch = 2

    patch_dim = channels * patch_size ** 2  # 32

    key = jax.random.PRNGKey(0)
    k_img, k_par = jax.random.split(key)
    img = jax.random.normal(k_img, (batch, channels, image_size, image_size),
                            dtype=jnp.float32)
    params = init_params(k_par, patch_dim=patch_dim, dim=dim, depth=depth,
                         mlp_dim=mlp_dim, num_classes=num_classes)
    params = fold_attention_scale(params, heads)   # one-time weight transform

    logits = vit_forward(img, params, patch_size=patch_size, heads=heads)
    logits = jax.block_until_ready(logits)
    assert logits.shape == (batch, num_classes)
    assert bool(jnp.all(jnp.isfinite(logits)))
    # TODO(synk): mask=True branch (Mask_sequence) uses torch.randperm/torch.rand
    # host control flow and is not implemented; dropout layers are inference identity.
    print("KERNEL_OK")
</pallas_src>

<mosaic_0001>
module attributes {stable_mosaic.version = 11 : i64} {
  func.func @_fused_linear_kernel(%arg0: i32, %arg1: i32, %arg2: i32, %arg3: memref<32x32xbf16, #tpu.memory_space<vmem>>, %arg4: memref<32x32xbf16, #tpu.memory_space<vmem>>, %arg5: memref<1x32xf32, #tpu.memory_space<vmem>>, %arg6: memref<32x32xf32, #tpu.memory_space<vmem>>) attributes {dimension_semantics = [#tpu.dimension_semantics<parallel>, #tpu.dimension_semantics<parallel>, #tpu.dimension_semantics<arbitrary>], iteration_bounds = array<i64: 1, 1, 1>, scalar_prefetch = 0 : i64, scratch_operands = 0 : i64, tpu.core_type = #tpu.core_type<tc>, window_params = [{transform_indices = @transform_0, window_bounds = array<i64: 32, 32>}, {transform_indices = @transform_1, window_bounds = array<i64: 32, 32>}, {transform_indices = @transform_2, window_bounds = array<i64: 1, 32>}, {transform_indices = @transform_3, window_bounds = array<i64: 32, 32>}]} {
    %c0 = arith.constant 0 : index
    %c0_0 = arith.constant 0 : index
    %0 = vector.load %arg3[%c0, %c0_0] : memref<32x32xbf16, #tpu.memory_space<vmem>>, vector<32x32xbf16>
    %c0_1 = arith.constant 0 : index
    %c0_2 = arith.constant 0 : index
    %1 = vector.load %arg4[%c0_1, %c0_2] : memref<32x32xbf16, #tpu.memory_space<vmem>>, vector<32x32xbf16>
    %cst = arith.constant dense<0.000000e+00> : vector<32x32xf32>
    %2 = tpu.matmul %0, %1, %cst {dimension_numbers = #tpu.dot_dimension_numbers<[1], [0], [0], [1], [0, 0, 1, 1], [], []>} : vector<32x32xbf16>, vector<32x32xbf16>, vector<32x32xf32> -> vector<32x32xf32>
    %c0_3 = arith.constant 0 : index
    %c0_4 = arith.constant 0 : index
    %3 = vector.load %arg5[%c0_3, %c0_4] : memref<1x32xf32, #tpu.memory_space<vmem>>, vector<1x32xf32>
    %4 = vector.broadcast %3 : vector<1x32xf32> to vector<32x32xf32>
    %5 = arith.addf %2, %4 : vector<32x32xf32>
    %c0_5 = arith.constant 0 : index
    %c0_6 = arith.constant 0 : index
    %6 = vector.load %arg6[%c0_5, %c0_6] : memref<32x32xf32, #tpu.memory_space<vmem>>, vector<32x32xf32>
    tpu.vector_store %arg6[%c0_5, %c0_6], %5 {strides = array<i32>} : memref<32x32xf32, #tpu.memory_space<vmem>>, vector<32x32xf32>,
    return
  }
  func.func @transform_0(%arg0: i32, %arg1: i32, %arg2: i32) -> (i32, i32) {
    %c0_i32 = arith.constant 0 : i32
    return %arg0, %arg2 : i32, i32
  }
  func.func @transform_1(%arg0: i32, %arg1: i32, %arg2: i32) -> (i32, i32) {
    %c0_i32 = arith.constant 0 : i32
    return %arg2, %arg1 : i32, i32
  }
  func.func @transform_2(%arg0: i32, %arg1: i32, %arg2: i32) -> (i32, i32) {
    %c0_i32 = arith.constant 0 : i32
    %c0_i32_0 = arith.constant 0 : i32
    return %c0_i32, %arg1 : i32, i32
  }
  func.func @transform_3(%arg0: i32, %arg1: i32, %arg2: i32) -> (i32, i32) {
    %c0_i32 = arith.constant 0 : i32
    return %arg0, %arg1 : i32, i32
  }
}

</mosaic_0001>

<bundles_post_ra>
// kernel: tpu_custom_call.1
= control target key start
LH: loop header
LB: loop body
LE: loop exit
PB: predicated region body
PF: predicated region fallthrough
CT: control target
= control target key end

     0   :  { %8 = vsyncpa [#allocation3], 0  ;;  %s333_s0 = inlined_call_operand.hbm [shape: bf16[32,32], index: 0, kind: input, shape index: {}]   ;;  %s334_s1 = inlined_call_operand.hbm [shape: bf16[32,32], index: 1, kind: input, shape index: {}]   ;;  %s335_s2 = inlined_call_operand.vmem [shape: f32[1,32], index: 2, kind: input, shape index: {}]   ;;  %s336_s3 = inlined_call_operand.hbm [shape: f32[32,32], index: 3, kind: output, shape index: {}]  }
   0x1   :  { %9 = vsyncpa [#allocation6], 0 }
   0x2   :  { %10 = vsyncpa [#allocation4], 0  ;;  %s261_s12 = smov [#allocation2]   ;;  %s189_s16 = scalar_lea.hbm %s333_s0, 256 }
   0x3   :  { %s16_s13 = sshll.u32 %s261_s12, 4  ;;  %p190_p0 = scmp.ne.s32.totalorder %s333_s0, %s189_s16  ;;  %s17_s13 = int_to_ptr.vmem [resolvable:$true] %s16_s13 }
   0x4   :  { %p193_p1 = scmp.lt.u32.totalorder %s189_s16, %s333_s0 }
   0x6   :  { %p195_p2 = pnand %p193_p1, %p190_p0 }
   0x8   :  { %198 = shalt.err (!%p195_p2)
}
   0x9   :  { %s199_s21 = scalar_lea.vmem %s17_s13, 256  ;;  %p204_p4 = scmp.lt.s32.totalorder %s17_s13, %s17_s13 }
   0xa   :  { %p200_p3 = scmp.ne.s32.totalorder %s17_s13, %s199_s21  ;;  %p205_p5 = scmp.lt.s32.totalorder %s199_s21, %s199_s21 }
   0xc   :  { %p206_p6 = por %p205_p5, %p204_p4 }
   0xe   :  { %p207_p7 = pnand %p206_p6, %p200_p3 }
  0x10   :  { %210 = shalt.err (!%p207_p7)
}
  0x11   :  { %s262_s22 = smov 64   ;;  %s263_s23 = smov 4  }
  0x12   :  { %22 = dma.hbm_to_vmem [thread:$0]  %s333_s0, 256, %s17_s13, [#allocation3], %s262_s22, %s262_s22, %s263_s23  }
  0x13   :  { %s264_s26 = smov [#allocation5]   ;;  %s211_s30 = scalar_lea.hbm %s334_s1, 256 }
  0x14   :  { %s28_s27 = sshll.u32 %s264_s26, 4  ;;  %p212_p8 = scmp.ne.s32.totalorder %s334_s1, %s211_s30  ;;  %s29_s27 = int_to_ptr.vmem [resolvable:$true] %s28_s27 }
  0x15   :  { %p215_p9 = scmp.lt.u32.totalorder %s211_s30, %s334_s1 }
  0x17   :  { %p217_p10 = pnand %p215_p9, %p212_p8 }
  0x19   :  { %220 = shalt.err (!%p217_p10)
}
  0x1a   :  { %s221_s8 = scalar_lea.vmem %s29_s27, 256  ;;  %p226_p12 = scmp.lt.s32.totalorder %s29_s27, %s29_s27 }
  0x1b   :  { %p222_p11 = scmp.ne.s32.totalorder %s29_s27, %s221_s8  ;;  %p227_p13 = scmp.lt.s32.totalorder %s221_s8, %s221_s8 }
  0x1d   :  { %p228_p0 = por %p227_p13, %p226_p12 }
  0x1f   :  { %p229_p1 = pnand %p228_p0, %p222_p11 }
  0x21   :  { %232 = shalt.err (!%p229_p1)
}
  0x22   :  { %34 = dma.hbm_to_vmem [thread:$0]  %s334_s1, 256, %s29_s27, [#allocation6], %s262_s22, %s262_s22, %s263_s23  }
  0x23   :  { %255 = dma.done.wait [#allocation3], 256  }
  0x24   :  { %256 = vsyncadd [#allocation3], 4294967040 }
  0x25   :  { %257 = dma.done.wait [#allocation6], 256  }
  0x26   :  { %258 = vsyncadd [#allocation6], 4294967040  ;;  %v185_v0 = vld [vmem:[#allocation5] sm:$0xff]   ;;  %v186_v1 = vld [vmem:[#allocation5 + $0x8] sm:$0xff]   ;;  %vm81_vm0 = vcmask 261120   ;;  %s265_s1 = smov [#allocation7]  }
  0x27   :  { %170 = vmatprep.subr.bf16.mxu0 %v185_v0  ;;  %v187_v2 = vld [vmem:[#allocation2] sm:$0xff]   ;;  %v188_v3 = vld [vmem:[#allocation2 + $0x8] sm:$0xff]   ;;  %s146_s12 = sshll.u32 %s265_s1, 4  ;;  %s147_s12 = int_to_ptr.vmem [resolvable:$true] %s146_s12 }
  0x28   :  { %171 = vmatpush3.bf16.msra.mxu0 %v185_v0  ;;  %174 = vmatprep.mubr.msk.bf16.mxu0 %vm81_vm0, %v187_v2  ;;  %v159_v4 = vld [vmem:[%s335_s2] ss:$0 sm:$0xff]  ;;  %s233_s2 = scalar_lea.vmem %s147_s12, 512  ;;  %p238_p3 = scmp.lt.s32.totalorder %s147_s12, %s147_s12 }
  0x29   :  { %172 = vmatprep.subr.bf16.mxu0 %v186_v1  ;;  %p234_p2 = scmp.ne.s32.totalorder %s147_s12, %s233_s2  ;;  %p239_p4 = scmp.lt.s32.totalorder %s233_s2, %s233_s2 }
  0x2b   :  { %p240_p5 = por %p239_p4, %p238_p3 }
  0x2c   :  { %173 = vmatpush3.bf16.msra.mxu0 %v186_v1 }
  0x2d   :  { %p241_p6 = pnand %p240_p5, %p234_p2 }
  0x2f   :  { %175 = vmatmul.mubr.msk.bf16.vlgmr.msra.gmra.mrb[0].mxu0 %vm81_vm0, %v188_v3 }
 0x102   :  { %v176_v5 = vpop.f32.mrb[0].mxu0 }
 0x103   :  { %v131_v6 = vadd.f32 %v176_v5, %v159_v4  ;;  %v122_v7 = vpop.f32.mrb[1].mxu0 }
 0x104   :  { %v123_v8 = vadd.f32 %v159_v4, %v122_v7  ;;  %v177_v9 = vpop.f32.mrb[2].mxu0 }
 0x105   :  { %139 = vst.msk [vmem:[#allocation7 + $0x10] sm:$0xff] %vm81_vm0, %v131_v6  ;;  %v134_v10 = vadd.f32 %v177_v9, %v159_v4  ;;  %v125_v11 = vpop.f32.mrb[3].mxu0 }
 0x106   :  { %137 = vst.msk [vmem:[#allocation7] sm:$0xff] %vm81_vm0, %v123_v8  ;;  %v126_v12 = vadd.f32 %v159_v4, %v125_v11 }
 0x107   :  { %140 = vst.msk [vmem:[#allocation7 + $0x18] sm:$0xff] %vm81_vm0, %v134_v10 }
 0x108   :  { %138 = vst.msk [vmem:[#allocation7 + $0x8] sm:$0xff] %vm81_vm0, %v126_v12 }
 0x109   :  { %244 = shalt.err (!%p241_p6)
}
 0x10a   :  { %s245_s15 = scalar_lea.hbm %s336_s3, 512 }
 0x10b   :  { %p246_p7 = scmp.ne.s32.totalorder %s336_s3, %s245_s15  ;;  %p249_p8 = scmp.lt.u32.totalorder %s245_s15, %s336_s3 }
 0x10d   :  { %p251_p9 = pnand %p249_p8, %p246_p7 }
 0x10f   :  { %254 = shalt.err (!%p251_p9)
}
 0x110   :  { %s266_s20 = smov 128   ;;  %s267_s21 = smov 8  }
 0x111   :  { %152 = dma.vmem_to_hbm [thread:$0]  %s147_s12, 512, %s336_s3, [#allocation4], %s266_s20, %s266_s20, %s267_s21  }
 0x112   :  { %259 = dma.done.wait [#allocation4], 512  }
 0x113   :  { %260 = vsyncadd [#allocation4], 4294966784 }
 0x114   :  { %156 = vsyncpa [#allocation3], 1 }
 0x115   :  { %157 = vsyncpa [#allocation6], 1 }
 0x116   :  { %158 = vsyncpa [#allocation4], 1 }

</bundles_post_ra>
